<compile_context>
chip_gen: v6e
topology: v6e:2x2x1
jax: 0.10.0
libtpu: 0.0.40
codegen_flags: <defaults>
</compile_context>

<pallas_src>
import jax
import jax.numpy as jnp
from jax.experimental import pallas as pl
from jax.experimental.pallas import tpu as pltpu


def _triangular_kernel(params_ref, x_ref, o_ref):
    # params_ref (SMEM): [left_foot, right_foot, 1/(peak-left), 1/(right-peak)]
    left = params_ref[0]
    right = params_ref[1]
    inv_rise = params_ref[2]
    inv_fall = params_ref[3]

    x = x_ref[...].astype(jnp.float32)
    t1 = (x - left) * inv_rise
    t2 = (right - x) * inv_fall
    o_ref[...] = jnp.maximum(jnp.minimum(t1, t2), jnp.float32(0.0)).astype(o_ref.dtype)


def triangular_forward(x, left_foot, peak, right_foot):
    """x: arbitrary-shaped float array (e.g. NCHW). Returns same shape/dtype."""
    orig_shape = x.shape
    orig_dtype = x.dtype
    n = x.size

    # Pick the widest lane-dense last dim that divides n exactly (no pad).
    lanes = None
    for w in (2048, 1024, 512, 256, 128):
        if n % w == 0:
            lanes = w
            break
    if lanes is None:
        lanes = 128  # ragged tail -> pad only in this (uncommon) case
    rows = -(-n // lanes)
    padded_n = rows * lanes

    x_flat = jnp.ravel(x)
    if padded_n != n:
        x_flat = jnp.pad(x_flat, (0, padded_n - n))
    x2d = x_flat.reshape(rows, lanes)

    # ~1 MiB f32 blocks; with double-buffered in+out that's ~4 MiB resident,
    # comfortably under scoped VMEM defaults on v5e/v6e/v7x.
    target_rows = max(8, (1 << 20) // (lanes * 4))
    if rows <= target_rows:
        tile_rows = rows  # full-dim block (exempt from the x8 divisibility rule)
    else:
        tile_rows = max(8, (target_rows // 8) * 8)
    grid_size = pl.cdiv(rows, tile_rows)

    lf = jnp.float32(left_foot)
    pk = jnp.float32(peak)
    rf = jnp.float32(right_foot)
    params = jnp.stack(
        [lf, rf, jnp.float32(1.0) / (pk - lf), jnp.float32(1.0) / (rf - pk)]
    ).astype(jnp.float32)

    out2d = pl.pallas_call(
        _triangular_kernel,
        out_shape=jax.ShapeDtypeStruct((rows, lanes), orig_dtype),
        grid_spec=pl.GridSpec(
            grid=(grid_size,),
            in_specs=[
                pl.BlockSpec(memory_space=pltpu.SMEM),             # scalar params
                pl.BlockSpec((tile_rows, lanes), lambda i: (i, 0)),  # x tile (VMEM)
            ],
            out_specs=pl.BlockSpec((tile_rows, lanes), lambda i: (i, 0)),
        ),
        compiler_params=pltpu.CompilerParams(
            dimension_semantics=("parallel",)
        ),
    )(params, x2d)

    out = out2d.reshape(-1)
    if padded_n != n:
        out = out[:n]
    return out.reshape(orig_shape)


def _reference(x, left_foot, peak, right_foot):
    xf = x.astype(jnp.float32)
    t1 = (xf - left_foot) / (peak - left_foot)
    t2 = (right_foot - xf) / (right_foot - peak)
    return jnp.maximum(jnp.minimum(t1, t2), 0.0).astype(x.dtype)


if __name__ == "__main__":
    key = jax.random.PRNGKey(0)

    # Deterministic "parameters" (init_parameter would make scalar tensors).
    left_foot = -1.0
    peak = 0.25
    right_foot = 1.5

    # Small NCHW-like input: batch=2, channels=4, spatial=16x16
    x = jax.random.normal(key, (2, 4, 16, 16), dtype=jnp.float32)

    y = triangular_forward(x, left_foot, peak, right_foot)
    y = jax.block_until_ready(y)

    ref = _reference(x, left_foot, peak, right_foot)
    assert y.shape == x.shape and y.dtype == x.dtype
    assert jnp.allclose(y, ref, atol=1e-5, rtol=1e-5), "mismatch vs reference"

    # Extra check: ragged size (exercises the padded-tail path).
    x2 = jax.random.normal(jax.random.PRNGKey(1), (3, 5, 7, 11), dtype=jnp.float32)
    y2 = jax.block_until_ready(triangular_forward(x2, left_foot, peak, right_foot))
    ref2 = _reference(x2, left_foot, peak, right_foot)
    assert y2.shape == x2.shape and y2.dtype == x2.dtype
    assert jnp.allclose(y2, ref2, atol=1e-5, rtol=1e-5), "mismatch vs reference (ragged)"

    print("KERNEL_OK")
</pallas_src>

<mosaic_0001>
module attributes {stable_mosaic.version = 11 : i64} {
  func.func @_triangular_kernel(%arg0: i32, %arg1: memref<4xf32, #tpu.memory_space<smem>>, %arg2: memref<1x2048xf32, #tpu.memory_space<vmem>>, %arg3: memref<1x2048xf32, #tpu.memory_space<vmem>>) attributes {dimension_semantics = [#tpu.dimension_semantics<parallel>], iteration_bounds = array<i64: 1>, scalar_prefetch = 0 : i64, scratch_operands = 0 : i64, tpu.core_type = #tpu.core_type<tc>, window_params = [{transform_indices = @transform_0, window_bounds = array<i64: 4>}, {transform_indices = @transform_1, window_bounds = array<i64: 1, 2048>}, {transform_indices = @transform_2, window_bounds = array<i64: 1, 2048>}]} {
    %c0 = arith.constant 0 : index
    %0 = memref.load %arg1[%c0] : memref<4xf32, #tpu.memory_space<smem>>
    %c1 = arith.constant 1 : index
    %1 = memref.load %arg1[%c1] : memref<4xf32, #tpu.memory_space<smem>>
    %c2 = arith.constant 2 : index
    %2 = memref.load %arg1[%c2] : memref<4xf32, #tpu.memory_space<smem>>
    %c3 = arith.constant 3 : index
    %3 = memref.load %arg1[%c3] : memref<4xf32, #tpu.memory_space<smem>>
    %c0_0 = arith.constant 0 : index
    %c0_1 = arith.constant 0 : index
    %4 = vector.load %arg2[%c0_0, %c0_1] : memref<1x2048xf32, #tpu.memory_space<vmem>>, vector<1x2048xf32>
    %5 = vector.broadcast %0 : f32 to vector<1x2048xf32>
    %6 = arith.subf %4, %5 : vector<1x2048xf32>
    %7 = vector.broadcast %2 : f32 to vector<1x2048xf32>
    %8 = arith.mulf %6, %7 : vector<1x2048xf32>
    %9 = vector.broadcast %1 : f32 to vector<1x2048xf32>
    %10 = arith.subf %9, %4 : vector<1x2048xf32>
    %11 = vector.broadcast %3 : f32 to vector<1x2048xf32>
    %12 = arith.mulf %10, %11 : vector<1x2048xf32>
    %13 = arith.minimumf %8, %12 : vector<1x2048xf32>
    %cst = arith.constant 0.000000e+00 : f32
    %14 = vector.broadcast %cst : f32 to vector<1x2048xf32>
    %15 = arith.maximumf %13, %14 : vector<1x2048xf32>
    %c0_2 = arith.constant 0 : index
    %c0_3 = arith.constant 0 : index
    %16 = vector.load %arg3[%c0_2, %c0_3] : memref<1x2048xf32, #tpu.memory_space<vmem>>, vector<1x2048xf32>
    tpu.vector_store %arg3[%c0_2, %c0_3], %15 {strides = array<i32>} : memref<1x2048xf32, #tpu.memory_space<vmem>>, vector<1x2048xf32>,
    return
  }
  func.func @transform_0(%arg0: i32) -> i32 {
    %c0_i32 = arith.constant 0 : i32
    %c0_i32_0 = arith.constant 0 : i32
    return %c0_i32 : i32
  }
  func.func @transform_1(%arg0: i32) -> (i32, i32) {
    %c0_i32 = arith.constant 0 : i32
    %c0_i32_0 = arith.constant 0 : i32
    return %arg0, %c0_i32 : i32, i32
  }
  func.func @transform_2(%arg0: i32) -> (i32, i32) {
    %c0_i32 = arith.constant 0 : i32
    %c0_i32_0 = arith.constant 0 : i32
    return %arg0, %c0_i32 : i32, i32
  }
}

</mosaic_0001>

<bundles_post_ra>
// kernel: tpu_custom_call.1
= control target key start
LH: loop header
LB: loop body
LE: loop exit
PB: predicated region body
PF: predicated region fallthrough
CT: control target
= control target key end

     0   :  { %7 = vsyncpa [#allocation5], 0  ;;  %s162_s0 = inlined_call_operand.hbm [shape: f32[4], index: 0, kind: input, shape index: {}]   ;;  %s163_s1 = inlined_call_operand.hbm [shape: f32[1,2048], index: 1, kind: input, shape index: {}]   ;;  %s164_s2 = inlined_call_operand.hbm [shape: f32[1,2048], index: 2, kind: output, shape index: {}]  }
   0x1   :  { %8 = vsyncpa [#allocation3], 0 }
   0x2   :  { %9 = vsyncpa [#allocation4], 0  ;;  %s135_s9 = smov [#allocation2]   ;;  %s136_s12 = smov [#allocation6]  }
   0x3   :  { %17 = dma.hbm_to_smem %s162_s0, 16, %s135_s9, [#allocation5]  }
   0x4   :  { %s24_s13 = sshll.u32 %s136_s12, 4  ;;  %s25_s13 = int_to_ptr.vmem [resolvable:$true] %s24_s13 }
   0x5   :  { %s97_s14 = scalar_lea.vmem %s25_s13, 256  ;;  %p102_p1 = scmp.lt.s32.totalorder %s25_s13, %s25_s13 }
   0x6   :  { %p98_p0 = scmp.ne.s32.totalorder %s25_s13, %s97_s14  ;;  %p103_p2 = scmp.lt.s32.totalorder %s97_s14, %s97_s14 }
   0x8   :  { %p104_p3 = por %p103_p2, %p102_p1 }
   0xa   :  { %p105_p4 = pnand %p104_p3, %p98_p0 }
   0xc   :  { %108 = shalt.err (!%p105_p4)
}
   0xd   :  { %27 = dma.hbm_to_vmem [thread:$0]  %s163_s1, 256, %s25_s13, [#allocation3]  }
   0xe   :  { %129 = dma.done.wait [#allocation5], 16  }
   0xf   :  { %130 = vsyncadd [#allocation5], 4294967280 }
  0x10   :  { %131 = dma.done.wait [#allocation3], 256  }
  0x11   :  { %132 = vsyncadd [#allocation3], 4294967040 }
  0x12   :  { %34 = sfence }
  0x13   :  { %s35_s0 = sld [smem:[#allocation2]]  ;;  %v39_v0 = vld [vmem:[#allocation6] sm:$0xff]  ;;  %v40_v1 = vld [vmem:[#allocation6 + $0x8] sm:$0xff]  ;;  %s137_s1 = smov [#allocation7]  }
  0x14   :  { %s75_s17 = sld [smem:[#allocation2 + $0x1]]  ;;  %s65_s20 = sshll.u32 %s137_s1, 4  ;;  %s66_s20 = int_to_ptr.vmem [resolvable:$true] %s65_s20 }
  0x15   :  { %s76_s18 = sld [smem:[#allocation2 + $0x2]]  ;;  %s109_s21 = scalar_lea.vmem %s66_s20, 256 }
  0x16   :  { %s77_s19 = sld [smem:[#allocation2 + $0x3]]  ;;  %p110_p5 = scmp.ne.s32.totalorder %s66_s20, %s109_s21 }
  0x17   :  { %p114_p6 = scmp.lt.s32.totalorder %s66_s20, %s66_s20  ;;  %p115_p7 = scmp.lt.s32.totalorder %s109_s21, %s109_s21 }
  0x19   :  { %v41_v2 = vstv %s35_s0  ;;  %p116_p8 = por %p115_p7, %p114_p6 }
  0x1a   :  { %v42_v3 = vsub.f32 %v39_v0, %v41_v2  ;;  %v47_v4 = vstv %s75_s17  ;;  %v43_v5 = vsub.f32 %v40_v1, %v41_v2 }
  0x1b   :  { %v44_v6 = vstv %s76_s18  ;;  %v48_v7 = vsub.f32 %v47_v4, %v39_v0  ;;  %v49_v8 = vsub.f32 %v47_v4, %v40_v1  ;;  %p117_p9 = pnand %p116_p8, %p110_p5 }
  0x1c   :  { %v45_v9 = vmul.f32 %v44_v6, %v42_v3  ;;  %v50_v10 = vstv %s77_s19  ;;  %v46_v11 = vmul.f32 %v44_v6, %v43_v5 }
  0x1d   :  { %v51_v12 = vmul.f32 %v50_v10, %v48_v7  ;;  %v52_v13 = vmul.f32 %v50_v10, %v49_v8 }
  0x1f   :  { %v53_v14 = vmin.f32 %v45_v9, %v51_v12  ;;  %v54_v15 = vmin.f32 %v46_v11, %v52_v13 }
  0x21   :  { %v55_v16 = vmax.f32 %v53_v14, 0.0  ;;  %v56_v17 = vmax.f32 %v54_v15, 0.0 }
  0x23   :  { %57 = vst [vmem:[#allocation7] sm:$0xff] %v55_v16  ;;  %58 = vst [vmem:[#allocation7 + $0x8] sm:$0xff] %v56_v17 }
  0x24   :  { %120 = shalt.err (!%p117_p9)
}
  0x25   :  { %68 = dma.vmem_to_hbm [thread:$0]  %s66_s20, 256, %s164_s2, [#allocation4]  }
  0x26   :  { %133 = dma.done.wait [#allocation4], 256  }
  0x27   :  { %134 = vsyncadd [#allocation4], 4294967040 }
  0x28   :  { %72 = vsyncpa [#allocation3], 1 }
  0x29   :  { %73 = vsyncpa [#allocation4], 1 }
  0x2a   :  { %74 = vsyncpa [#allocation5], 1 }

</bundles_post_ra>
